<compile_context>
chip_gen: v7x
topology: tpu7x:2x2x1
jax: 0.10.0
libtpu: 0.0.40
codegen_flags: <defaults>
</compile_context>

<pallas_src>
import jax
import jax.numpy as jnp
from jax.experimental import pallas as pl
from jax.experimental.pallas import tpu as pltpu

BRANCH_IN = 101                      # branch_dim
TRUNK_IN = 2                         # trunk_dim
HIDDEN = 40
FUSED = 2 * HIDDEN                   # 80 lanes: [0:40] branch, [40:80] trunk
N_BLOCKS = 7                         # hidden MlpBlocks in both branch and trunk
TB_MAX = 8192                        # batch-tile cap (~9 MiB VMEM worst case)


def _round_up(x, m):
    return (x + m - 1) // m * m


def deeponet_kernel(u_ref, y_ref, w0u_ref, w0y_ref, b0_ref, wh_ref, bh_ref,
                    dec_ref, dbias_ref, nbias_ref, out_ref):
    """One batch tile of the full DeepONet forward.

    u_ref    : [TB, 101]   bf16  branch input
    y_ref    : [TB, 2]     bf16  trunk input
    w0u_ref  : [101, 80]   bf16  branch first Linear in cols 0:40, zeros in 40:80
    w0y_ref  : [2, 80]     bf16  trunk encoder in cols 40:80, zeros in 0:40
    b0_ref   : [1, 80]     f32   concat biases
    wh_ref   : [7, 80, 80] bf16  block-diag hidden Linear weights
    bh_ref   : [7, 1, 80]  f32   concat hidden biases
    dec_ref  : [80, 80]    bf16  (DAM mask * trunk decoder) in rows 40:80, cols 0:40
    dbias_ref: [1, 80]     f32   [decoder bias, zeros(40)]
    nbias_ref: [1, 1]      f32   net_bias
    out_ref  : [1, 1, TB]  f32   lane-dense result row for this tile
    """
    bf16 = jnp.bfloat16

    # Fused branch+trunk chain: (Linear + tanh) x (1 + 7), 80 lanes wide.
    # u contributes exact zeros to trunk lanes and vice versa, so this equals
    # the two independent chains.
    a = jnp.tanh(
        jnp.dot(u_ref[...], w0u_ref[...], preferred_element_type=jnp.float32)
        + jnp.dot(y_ref[...], w0y_ref[...], preferred_element_type=jnp.float32)
        + b0_ref[...])
    for i in range(N_BLOCKS):
        a = jnp.tanh(
            jnp.dot(a.astype(bf16), wh_ref[i],
                    preferred_element_type=jnp.float32)
            + bh_ref[i])

    # DAM + decoder: the mask is folded into dec_ref rows, so a single matmul
    # produces the (masked) trunk decoder output in cols 0:40 (cols 40:80 == 0).
    t = (jnp.dot(a.astype(bf16), dec_ref[...],
                 preferred_element_type=jnp.float32)
         + dbias_ref[...])

    # DeepONet combine: sum(B * T, dim=1) + net_bias.  Trunk lanes contribute
    # a * 0 == 0, so the 80-lane reduction equals the original 40-lane one.
    # Stored as a lane-dense [1, 1, TB] row (batch along lanes).
    row = jnp.sum(a * t, axis=1)[None, :] + nbias_ref[...]          # (1, TB)
    out_ref[...] = row.reshape(1, 1, row.shape[-1])


def make_params(key):
    """Deterministic parameter init (shapes follow the PyTorch module)."""
    n_keys = 4 * N_BLOCKS + 6        # 34: exactly what is consumed below
    keys = jax.random.split(key, n_keys)
    k = iter(keys)

    def w(shape, kk):
        # weights stored as [in, out] so forward is x @ W + b
        fan_in = shape[0]
        return jax.random.normal(kk, shape, jnp.float32) / jnp.sqrt(fan_in)

    params = {}
    # Branch net
    params["bw0"] = w((BRANCH_IN, HIDDEN), next(k))
    params["bb0"] = jax.random.normal(next(k), (1, HIDDEN), jnp.float32) * 0.1
    params["bws"] = jnp.stack([w((HIDDEN, HIDDEN), next(k)) for _ in range(N_BLOCKS)])
    params["bbs"] = jnp.stack(
        [jax.random.normal(next(k), (1, HIDDEN), jnp.float32) * 0.1
         for _ in range(N_BLOCKS)])
    # Trunk net (PINN)
    params["tw0"] = w((TRUNK_IN, HIDDEN), next(k))
    params["tb0"] = jax.random.normal(next(k), (1, HIDDEN), jnp.float32) * 0.1
    params["tws"] = jnp.stack([w((HIDDEN, HIDDEN), next(k)) for _ in range(N_BLOCKS)])
    params["tbs"] = jnp.stack(
        [jax.random.normal(next(k), (1, HIDDEN), jnp.float32) * 0.1
         for _ in range(N_BLOCKS)])
    params["dw"] = w((HIDDEN, HIDDEN), next(k))
    params["db"] = jax.random.normal(next(k), (1, HIDDEN), jnp.float32) * 0.1

    # DAM mask: relu(tanh(alpha^2 * (mu + beta))), mu = arange(40)/40*5,
    # alpha = beta = 1 (their init values).
    mu = jnp.arange(HIDDEN, dtype=jnp.float32) / HIDDEN * 5.0
    params["mask"] = jnp.maximum(jnp.tanh(1.0 * (mu + 1.0)), 0.0).reshape(1, HIDDEN)

    params["net_bias"] = jnp.zeros((1, 1), jnp.float32)
    return params


def fuse_params(p):
    """Build the 80-lane fused parameter set used by the kernel."""
    w0u = jnp.zeros((BRANCH_IN, FUSED), jnp.float32).at[:, :HIDDEN].set(p["bw0"])
    w0y = jnp.zeros((TRUNK_IN, FUSED), jnp.float32).at[:, HIDDEN:].set(p["tw0"])
    b0 = jnp.concatenate([p["bb0"], p["tb0"]], axis=1)              # [1, 80]

    wh = jnp.zeros((N_BLOCKS, FUSED, FUSED), jnp.float32)
    wh = wh.at[:, :HIDDEN, :HIDDEN].set(p["bws"])
    wh = wh.at[:, HIDDEN:, HIDDEN:].set(p["tws"])
    bh = jnp.concatenate([p["bbs"], p["tbs"]], axis=2)              # [7, 1, 80]

    # DAM mask folded into decoder weights in f32 BEFORE the bf16 cast.
    dw_masked = p["mask"][0][:, None] * p["dw"]                     # [40, 40]
    dec = jnp.zeros((FUSED, FUSED), jnp.float32).at[HIDDEN:, :HIDDEN].set(dw_masked)
    dbias = jnp.concatenate(
        [p["db"], jnp.zeros((1, HIDDEN), jnp.float32)], axis=1)     # [1, 80]

    return dict(
        w0u=w0u.astype(jnp.bfloat16), w0y=w0y.astype(jnp.bfloat16), b0=b0,
        wh=wh.astype(jnp.bfloat16), bh=bh,
        dec=dec.astype(jnp.bfloat16), dbias=dbias,
        net_bias=p["net_bias"])


def deeponet_forward(u, y, fused, tb=None):
    """u: [B, 101], y: [B, 2]  ->  [B, 1] float32."""
    B = u.shape[0]
    # Stream inputs in bf16 (MXU-native, half the HBM bytes of f32).
    # PINN.forward re-concats (y[:,0:1], y[:,1:2]) == y, so y passes through.
    u = u.astype(jnp.bfloat16)
    y = y.astype(jnp.bfloat16)

    if tb is None:
        # >= 2 grid steps whenever B > 8 so the parallel batch axis can span
        # both v7x TensorCores; capped so big batches still fit scoped VMEM.
        tb = min(TB_MAX, max(8, _round_up(pl.cdiv(B, 2), 8)))
    tb = max(8, _round_up(int(tb), 8))
    b_pad = _round_up(B, tb)
    if b_pad != B:                                                  # pad rows sliced off below
        u = jnp.pad(u, ((0, b_pad - B), (0, 0)))
        y = jnp.pad(y, ((0, b_pad - B), (0, 0)))
    num_tiles = b_pad // tb

    const2 = lambda i: (0, 0)
    const3 = lambda i: (0, 0, 0)
    in_specs = [
        pl.BlockSpec((tb, BRANCH_IN), lambda i: (i, 0)),            # u : streamed per tile
        pl.BlockSpec((tb, TRUNK_IN), lambda i: (i, 0)),             # y : streamed per tile
        pl.BlockSpec((BRANCH_IN, FUSED), const2),                   # w0u  (VMEM-resident)
        pl.BlockSpec((TRUNK_IN, FUSED), const2),                    # w0y
        pl.BlockSpec((1, FUSED), const2),                           # b0
        pl.BlockSpec((N_BLOCKS, FUSED, FUSED), const3),             # wh
        pl.BlockSpec((N_BLOCKS, 1, FUSED), const3),                 # bh
        pl.BlockSpec((FUSED, FUSED), const2),                       # dec (mask folded in)
        pl.BlockSpec((1, FUSED), const2),                           # dbias
        pl.BlockSpec((1, 1), const2),                               # net_bias
    ]
    # Lane-dense output: one [1, 1, tb] row per tile (batch along lanes).
    out_specs = pl.BlockSpec((1, 1, tb), lambda i: (i, 0, 0))

    out = pl.pallas_call(
        deeponet_kernel,
        out_shape=jax.ShapeDtypeStruct((num_tiles, 1, tb), jnp.float32),
        grid=(num_tiles,),
        in_specs=in_specs,
        out_specs=out_specs,
        compiler_params=pltpu.CompilerParams(
            dimension_semantics=("parallel",),
            vmem_limit_bytes=32 * 1024 * 1024),                     # v5e default is only 16 MiB
    )(u, y, fused["w0u"], fused["w0y"], fused["b0"], fused["wh"], fused["bh"],
      fused["dec"], fused["dbias"], fused["net_bias"])
    return out.reshape(b_pad, 1)[:B]


def deeponet_reference(u, y, params):
    """Pure-JAX reference mirroring the PyTorch forward structure
    (separate branch/trunk, t/x re-concat, DAM, decoder, combine) with the same
    numerics as the kernel: bf16 matmul inputs, f32 accumulation/elementwise,
    and the DAM mask folded into the decoder weights in f32 (mathematically
    identical to (g * mask) @ dw)."""
    bf = lambda a: a.astype(jnp.bfloat16)
    dot = lambda a, w: jnp.dot(bf(a), bf(w), preferred_element_type=jnp.float32)

    h = jnp.tanh(dot(u, params["bw0"]) + params["bb0"])
    for i in range(N_BLOCKS):
        h = jnp.tanh(dot(h, params["bws"][i]) + params["bbs"][i])

    t_col = y[:, 0:1]
    x_col = y[:, 1:2]
    yy = jnp.concatenate([t_col, x_col], axis=1)
    g = jnp.tanh(dot(yy, params["tw0"]) + params["tb0"])
    for i in range(N_BLOCKS):
        g = jnp.tanh(dot(g, params["tws"][i]) + params["tbs"][i])
    dw_masked = params["mask"][0][:, None] * params["dw"]           # DAM folded (f32)
    t = dot(g, dw_masked) + params["db"]

    out = jnp.sum(h * t, axis=1) + params["net_bias"][0, 0]
    return out[:, None]


if __name__ == "__main__":
    key = jax.random.PRNGKey(0)
    kp, ku, ky = jax.random.split(key, 3)

    params = make_params(kp)
    fused = fuse_params(params)

    BATCH = 24                      # small demo
    u = jax.random.normal(ku, (BATCH, BRANCH_IN), jnp.float32)
    y = jax.random.normal(ky, (BATCH, TRUNK_IN), jnp.float32)

    out = jax.block_until_ready(deeponet_forward(u, y, fused, tb=8))   # 3 grid steps
    out2 = jax.block_until_ready(deeponet_forward(u, y, fused))        # default tb -> padding path
    ref = jax.block_until_ready(deeponet_reference(u, y, params))

    assert out.shape == (BATCH, 1), out.shape
    assert jnp.allclose(out, ref, atol=1e-3, rtol=1e-3), (
        float(jnp.max(jnp.abs(out - ref))))
    assert jnp.allclose(out2, ref, atol=1e-3, rtol=1e-3), (
        float(jnp.max(jnp.abs(out2 - ref))))

    print("KERNEL_OK")
</pallas_src>

<mosaic_0001>
module attributes {stable_mosaic.version = 11 : i64} {
  func.func @deeponet_kernel(%arg0: i32, %arg1: memref<8x101xbf16, #tpu.memory_space<vmem>>, %arg2: memref<8x2xbf16, #tpu.memory_space<vmem>>, %arg3: memref<101x80xbf16, #tpu.memory_space<vmem>>, %arg4: memref<2x80xbf16, #tpu.memory_space<vmem>>, %arg5: memref<1x80xf32, #tpu.memory_space<vmem>>, %arg6: memref<7x80x80xbf16, #tpu.memory_space<vmem>>, %arg7: memref<7x1x80xf32, #tpu.memory_space<vmem>>, %arg8: memref<80x80xbf16, #tpu.memory_space<vmem>>, %arg9: memref<1x80xf32, #tpu.memory_space<vmem>>, %arg10: memref<1x1xf32, #tpu.memory_space<vmem>>, %arg11: memref<1x1x8xf32, #tpu.memory_space<vmem>>) attributes {dimension_semantics = [#tpu.dimension_semantics<parallel>], iteration_bounds = array<i64: 3>, scalar_prefetch = 0 : i64, scratch_operands = 0 : i64, tpu.core_type = #tpu.core_type<tc>, window_params = [{transform_indices = @transform_0, window_bounds = array<i64: 8, 101>}, {transform_indices = @transform_1, window_bounds = array<i64: 8, 2>}, {pipeline_mode = #tpu.pipeline_mode<synchronous>, transform_indices = @transform_2, window_bounds = array<i64: 101, 80>}, {pipeline_mode = #tpu.pipeline_mode<synchronous>, transform_indices = @transform_3, window_bounds = array<i64: 2, 80>}, {pipeline_mode = #tpu.pipeline_mode<synchronous>, transform_indices = @transform_4, window_bounds = array<i64: 1, 80>}, {pipeline_mode = #tpu.pipeline_mode<synchronous>, transform_indices = @transform_5, window_bounds = array<i64: 7, 80, 80>}, {pipeline_mode = #tpu.pipeline_mode<synchronous>, transform_indices = @transform_6, window_bounds = array<i64: 7, 1, 80>}, {pipeline_mode = #tpu.pipeline_mode<synchronous>, transform_indices = @transform_7, window_bounds = array<i64: 80, 80>}, {pipeline_mode = #tpu.pipeline_mode<synchronous>, transform_indices = @transform_8, window_bounds = array<i64: 1, 80>}, {pipeline_mode = #tpu.pipeline_mode<synchronous>, transform_indices = @transform_9, window_bounds = array<i64: 1, 1>}, {transform_indices = @transform_10, window_bounds = array<i64: 1, 1, 8>}]} {
    %c0 = arith.constant 0 : index
    %c0_0 = arith.constant 0 : index
    %0 = vector.load %arg1[%c0, %c0_0] : memref<8x101xbf16, #tpu.memory_space<vmem>>, vector<8x101xbf16>
    %c0_1 = arith.constant 0 : index
    %c0_2 = arith.constant 0 : index
    %1 = vector.load %arg3[%c0_1, %c0_2] : memref<101x80xbf16, #tpu.memory_space<vmem>>, vector<101x80xbf16>
    %cst = arith.constant dense<0.000000e+00> : vector<8x80xf32>
    %2 = tpu.matmul %0, %1, %cst {dimension_numbers = #tpu.dot_dimension_numbers<[1], [0], [0], [1], [0, 0, 1, 1], [], []>} : vector<8x101xbf16>, vector<101x80xbf16>, vector<8x80xf32> -> vector<8x80xf32>
    %c0_3 = arith.constant 0 : index
    %c0_4 = arith.constant 0 : index
    %3 = vector.load %arg2[%c0_3, %c0_4] : memref<8x2xbf16, #tpu.memory_space<vmem>>, vector<8x2xbf16>
    %c0_5 = arith.constant 0 : index
    %c0_6 = arith.constant 0 : index
    %4 = vector.load %arg4[%c0_5, %c0_6] : memref<2x80xbf16, #tpu.memory_space<vmem>>, vector<2x80xbf16>
    %cst_7 = arith.constant dense<0.000000e+00> : vector<8x80xf32>
    %5 = tpu.matmul %3, %4, %cst_7 {dimension_numbers = #tpu.dot_dimension_numbers<[1], [0], [0], [1], [0, 0, 1, 1], [], []>} : vector<8x2xbf16>, vector<2x80xbf16>, vector<8x80xf32> -> vector<8x80xf32>
    %6 = arith.addf %2, %5 : vector<8x80xf32>
    %c0_8 = arith.constant 0 : index
    %c0_9 = arith.constant 0 : index
    %7 = vector.load %arg5[%c0_8, %c0_9] : memref<1x80xf32, #tpu.memory_space<vmem>>, vector<1x80xf32>
    %8 = vector.broadcast %7 : vector<1x80xf32> to vector<8x80xf32>
    %9 = arith.addf %6, %8 : vector<8x80xf32>
    %10 = math.tanh %9 : vector<8x80xf32>
    %11 = arith.truncf %10 : vector<8x80xf32> to vector<8x80xbf16>
    %c0_10 = arith.constant 0 : index
    %c0_11 = arith.constant 0 : index
    %c0_12 = arith.constant 0 : index
    %12 = vector.load %arg6[%c0_10, %c0_11, %c0_12] : memref<7x80x80xbf16, #tpu.memory_space<vmem>>, vector<1x80x80xbf16>
    %13 = vector.shape_cast %12 : vector<1x80x80xbf16> to vector<80x80xbf16>
    %cst_13 = arith.constant dense<0.000000e+00> : vector<8x80xf32>
    %14 = tpu.matmul %11, %13, %cst_13 {dimension_numbers = #tpu.dot_dimension_numbers<[1], [0], [0], [1], [0, 0, 1, 1], [], []>} : vector<8x80xbf16>, vector<80x80xbf16>, vector<8x80xf32> -> vector<8x80xf32>
    %c0_14 = arith.constant 0 : index
    %c0_15 = arith.constant 0 : index
    %c0_16 = arith.constant 0 : index
    %15 = vector.load %arg7[%c0_14, %c0_15, %c0_16] : memref<7x1x80xf32, #tpu.memory_space<vmem>>, vector<1x1x80xf32>
    %16 = vector.shape_cast %15 : vector<1x1x80xf32> to vector<1x80xf32>
    %17 = vector.broadcast %16 : vector<1x80xf32> to vector<8x80xf32>
    %18 = arith.addf %14, %17 : vector<8x80xf32>
    %19 = math.tanh %18 : vector<8x80xf32>
    %20 = arith.truncf %19 : vector<8x80xf32> to vector<8x80xbf16>
    %c1 = arith.constant 1 : index
    %c0_17 = arith.constant 0 : index
    %c0_18 = arith.constant 0 : index
    %21 = vector.load %arg6[%c1, %c0_17, %c0_18] : memref<7x80x80xbf16, #tpu.memory_space<vmem>>, vector<1x80x80xbf16>
    %22 = vector.shape_cast %21 : vector<1x80x80xbf16> to vector<80x80xbf16>
    %cst_19 = arith.constant dense<0.000000e+00> : vector<8x80xf32>
    %23 = tpu.matmul %20, %22, %cst_19 {dimension_numbers = #tpu.dot_dimension_numbers<[1], [0], [0], [1], [0, 0, 1, 1], [], []>} : vector<8x80xbf16>, vector<80x80xbf16>, vector<8x80xf32> -> vector<8x80xf32>
    %c1_20 = arith.constant 1 : index
    %c0_21 = arith.constant 0 : index
    %c0_22 = arith.constant 0 : index
    %24 = vector.load %arg7[%c1_20, %c0_21, %c0_22] : memref<7x1x80xf32, #tpu.memory_space<vmem>>, vector<1x1x80xf32>
    %25 = vector.shape_cast %24 : vector<1x1x80xf32> to vector<1x80xf32>
    %26 = vector.broadcast %25 : vector<1x80xf32> to vector<8x80xf32>
    %27 = arith.addf %23, %26 : vector<8x80xf32>
    %28 = math.tanh %27 : vector<8x80xf32>
    %29 = arith.truncf %28 : vector<8x80xf32> to vector<8x80xbf16>
    %c2 = arith.constant 2 : index
    %c0_23 = arith.constant 0 : index
    %c0_24 = arith.constant 0 : index
    %30 = vector.load %arg6[%c2, %c0_23, %c0_24] : memref<7x80x80xbf16, #tpu.memory_space<vmem>>, vector<1x80x80xbf16>
    %31 = vector.shape_cast %30 : vector<1x80x80xbf16> to vector<80x80xbf16>
    %cst_25 = arith.constant dense<0.000000e+00> : vector<8x80xf32>
    %32 = tpu.matmul %29, %31, %cst_25 {dimension_numbers = #tpu.dot_dimension_numbers<[1], [0], [0], [1], [0, 0, 1, 1], [], []>} : vector<8x80xbf16>, vector<80x80xbf16>, vector<8x80xf32> -> vector<8x80xf32>
    %c2_26 = arith.constant 2 : index
    %c0_27 = arith.constant 0 : index
    %c0_28 = arith.constant 0 : index
    %33 = vector.load %arg7[%c2_26, %c0_27, %c0_28] : memref<7x1x80xf32, #tpu.memory_space<vmem>>, vector<1x1x80xf32>
    %34 = vector.shape_cast %33 : vector<1x1x80xf32> to vector<1x80xf32>
    %35 = vector.broadcast %34 : vector<1x80xf32> to vector<8x80xf32>
    %36 = arith.addf %32, %35 : vector<8x80xf32>
    %37 = math.tanh %36 : vector<8x80xf32>
    %38 = arith.truncf %37 : vector<8x80xf32> to vector<8x80xbf16>
    %c3 = arith.constant 3 : index
    %c0_29 = arith.constant 0 : index
    %c0_30 = arith.constant 0 : index
    %39 = vector.load %arg6[%c3, %c0_29, %c0_30] : memref<7x80x80xbf16, #tpu.memory_space<vmem>>, vector<1x80x80xbf16>
    %40 = vector.shape_cast %39 : vector<1x80x80xbf16> to vector<80x80xbf16>
    %cst_31 = arith.constant dense<0.000000e+00> : vector<8x80xf32>
    %41 = tpu.matmul %38, %40, %cst_31 {dimension_numbers = #tpu.dot_dimension_numbers<[1], [0], [0], [1], [0, 0, 1, 1], [], []>} : vector<8x80xbf16>, vector<80x80xbf16>, vector<8x80xf32> -> vector<8x80xf32>
    %c3_32 = arith.constant 3 : index
    %c0_33 = arith.constant 0 : index
    %c0_34 = arith.constant 0 : index
    %42 = vector.load %arg7[%c3_32, %c0_33, %c0_34] : memref<7x1x80xf32, #tpu.memory_space<vmem>>, vector<1x1x80xf32>
    %43 = vector.shape_cast %42 : vector<1x1x80xf32> to vector<1x80xf32>
    %44 = vector.broadcast %43 : vector<1x80xf32> to vector<8x80xf32>
    %45 = arith.addf %41, %44 : vector<8x80xf32>
    %46 = math.tanh %45 : vector<8x80xf32>
    %47 = arith.truncf %46 : vector<8x80xf32> to vector<8x80xbf16>
    %c4 = arith.constant 4 : index
    %c0_35 = arith.constant 0 : index
    %c0_36 = arith.constant 0 : index
    %48 = vector.load %arg6[%c4, %c0_35, %c0_36] : memref<7x80x80xbf16, #tpu.memory_space<vmem>>, vector<1x80x80xbf16>
    %49 = vector.shape_cast %48 : vector<1x80x80xbf16> to vector<80x80xbf16>
    %cst_37 = arith.constant dense<0.000000e+00> : vector<8x80xf32>
    %50 = tpu.matmul %47, %49, %cst_37 {dimension_numbers = #tpu.dot_dimension_numbers<[1], [0], [0], [1], [0, 0, 1, 1], [], []>} : vector<8x80xbf16>, vector<80x80xbf16>, vector<8x80xf32> -> vector<8x80xf32>
    %c4_38 = arith.constant 4 : index
    %c0_39 = arith.constant 0 : index
    %c0_40 = arith.constant 0 : index
    %51 = vector.load %arg7[%c4_38, %c0_39, %c0_40] : memref<7x1x80xf32, #tpu.memory_space<vmem>>, vector<1x1x80xf32>
    %52 = vector.shape_cast %51 : vector<1x1x80xf32> to vector<1x80xf32>
    %53 = vector.broadcast %52 : vector<1x80xf32> to vector<8x80xf32>
    %54 = arith.addf %50, %53 : vector<8x80xf32>
    %55 = math.tanh %54 : vector<8x80xf32>
    %56 = arith.truncf %55 : vector<8x80xf32> to vector<8x80xbf16>
    %c5 = arith.constant 5 : index
    %c0_41 = arith.constant 0 : index
    %c0_42 = arith.constant 0 : index
    %57 = vector.load %arg6[%c5, %c0_41, %c0_42] : memref<7x80x80xbf16, #tpu.memory_space<vmem>>, vector<1x80x80xbf16>
    %58 = vector.shape_cast %57 : vector<1x80x80xbf16> to vector<80x80xbf16>
    %cst_43 = arith.constant dense<0.000000e+00> : vector<8x80xf32>
    %59 = tpu.matmul %56, %58, %cst_43 {dimension_numbers = #tpu.dot_dimension_numbers<[1], [0], [0], [1], [0, 0, 1, 1], [], []>} : vector<8x80xbf16>, vector<80x80xbf16>, vector<8x80xf32> -> vector<8x80xf32>
    %c5_44 = arith.constant 5 : index
    %c0_45 = arith.constant 0 : index
    %c0_46 = arith.constant 0 : index
    %60 = vector.load %arg7[%c5_44, %c0_45, %c0_46] : memref<7x1x80xf32, #tpu.memory_space<vmem>>, vector<1x1x80xf32>
    %61 = vector.shape_cast %60 : vector<1x1x80xf32> to vector<1x80xf32>
    %62 = vector.broadcast %61 : vector<1x80xf32> to vector<8x80xf32>
    %63 = arith.addf %59, %62 : vector<8x80xf32>
    %64 = math.tanh %63 : vector<8x80xf32>
    %65 = arith.truncf %64 : vector<8x80xf32> to vector<8x80xbf16>
    %c6 = arith.constant 6 : index
    %c0_47 = arith.constant 0 : index
    %c0_48 = arith.constant 0 : index
    %66 = vector.load %arg6[%c6, %c0_47, %c0_48] : memref<7x80x80xbf16, #tpu.memory_space<vmem>>, vector<1x80x80xbf16>
    %67 = vector.shape_cast %66 : vector<1x80x80xbf16> to vector<80x80xbf16>
    %cst_49 = arith.constant dense<0.000000e+00> : vector<8x80xf32>
    %68 = tpu.matmul %65, %67, %cst_49 {dimension_numbers = #tpu.dot_dimension_numbers<[1], [0], [0], [1], [0, 0, 1, 1], [], []>} : vector<8x80xbf16>, vector<80x80xbf16>, vector<8x80xf32> -> vector<8x80xf32>
    %c6_50 = arith.constant 6 : index
    %c0_51 = arith.constant 0 : index
    %c0_52 = arith.constant 0 : index
    %69 = vector.load %arg7[%c6_50, %c0_51, %c0_52] : memref<7x1x80xf32, #tpu.memory_space<vmem>>, vector<1x1x80xf32>
    %70 = vector.shape_cast %69 : vector<1x1x80xf32> to vector<1x80xf32>
    %71 = vector.broadcast %70 : vector<1x80xf32> to vector<8x80xf32>
    %72 = arith.addf %68, %71 : vector<8x80xf32>
    %73 = math.tanh %72 : vector<8x80xf32>
    %74 = arith.truncf %73 : vector<8x80xf32> to vector<8x80xbf16>
    %c0_53 = arith.constant 0 : index
    %c0_54 = arith.constant 0 : index
    %75 = vector.load %arg8[%c0_53, %c0_54] : memref<80x80xbf16, #tpu.memory_space<vmem>>, vector<80x80xbf16>
    %cst_55 = arith.constant dense<0.000000e+00> : vector<8x80xf32>
    %76 = tpu.matmul %74, %75, %cst_55 {dimension_numbers = #tpu.dot_dimension_numbers<[1], [0], [0], [1], [0, 0, 1, 1], [], []>} : vector<8x80xbf16>, vector<80x80xbf16>, vector<8x80xf32> -> vector<8x80xf32>
    %c0_56 = arith.constant 0 : index
    %c0_57 = arith.constant 0 : index
    %77 = vector.load %arg9[%c0_56, %c0_57] : memref<1x80xf32, #tpu.memory_space<vmem>>, vector<1x80xf32>
    %78 = vector.broadcast %77 : vector<1x80xf32> to vector<8x80xf32>
    %79 = arith.addf %76, %78 : vector<8x80xf32>
    %80 = arith.mulf %73, %79 : vector<8x80xf32>
    %cst_58 = arith.constant dense<0.000000e+00> : vector<8xf32>
    %81 = vector.multi_reduction <add>, %80, %cst_58 [1] : vector<8x80xf32> to vector<8xf32>
    %82 = vector.shape_cast %81 : vector<8xf32> to vector<1x8xf32>
    %c0_59 = arith.constant 0 : index
    %c0_60 = arith.constant 0 : index
    %83 = vector.load %arg10[%c0_59, %c0_60] : memref<1x1xf32, #tpu.memory_space<vmem>>, vector<1x1xf32>
    %84 = vector.broadcast %83 : vector<1x1xf32> to vector<1x8xf32>
    %85 = arith.addf %82, %84 : vector<1x8xf32>
    %86 = vector.shape_cast %85 : vector<1x8xf32> to vector<1x1x8xf32>
    %c0_61 = arith.constant 0 : index
    %c0_62 = arith.constant 0 : index
    %c0_63 = arith.constant 0 : index
    %87 = vector.load %arg11[%c0_61, %c0_62, %c0_63] : memref<1x1x8xf32, #tpu.memory_space<vmem>>, vector<1x1x8xf32>
    tpu.vector_store %arg11[%c0_61, %c0_62, %c0_63], %86 {strides = array<i32>} : memref<1x1x8xf32, #tpu.memory_space<vmem>>, vector<1x1x8xf32>,
    return
  }
  func.func @transform_0(%arg0: i32) -> (i32, i32) {
    %c0_i32 = arith.constant 0 : i32
    %c0_i32_0 = arith.constant 0 : i32
    return %arg0, %c0_i32 : i32, i32
  }
  func.func @transform_1(%arg0: i32) -> (i32, i32) {
    %c0_i32 = arith.constant 0 : i32
    %c0_i32_0 = arith.constant 0 : i32
    return %arg0, %c0_i32 : i32, i32
  }
  func.func @transform_2(%arg0: i32) -> (i32, i32) {
    %c0_i32 = arith.constant 0 : i32
    %c0_i32_0 = arith.constant 0 : i32
    %c0_i32_1 = arith.constant 0 : i32
    return %c0_i32, %c0_i32_0 : i32, i32
  }
  func.func @transform_3(%arg0: i32) -> (i32, i32) {
    %c0_i32 = arith.constant 0 : i32
    %c0_i32_0 = arith.constant 0 : i32
    %c0_i32_1 = arith.constant 0 : i32
    return %c0_i32, %c0_i32_0 : i32, i32
  }
  func.func @transform_4(%arg0: i32) -> (i32, i32) {
    %c0_i32 = arith.constant 0 : i32
    %c0_i32_0 = arith.constant 0 : i32
    %c0_i32_1 = arith.constant 0 : i32
    return %c0_i32, %c0_i32_0 : i32, i32
  }
  func.func @transform_5(%arg0: i32) -> (i32, i32, i32) {
    %c0_i32 = arith.constant 0 : i32
    %c0_i32_0 = arith.constant 0 : i32
    %c0_i32_1 = arith.constant 0 : i32
    %c0_i32_2 = arith.constant 0 : i32
    return %c0_i32, %c0_i32_0, %c0_i32_1 : i32, i32, i32
  }
  func.func @transform_6(%arg0: i32) -> (i32, i32, i32) {
    %c0_i32 = arith.constant 0 : i32
    %c0_i32_0 = arith.constant 0 : i32
    %c0_i32_1 = arith.constant 0 : i32
    %c0_i32_2 = arith.constant 0 : i32
    return %c0_i32, %c0_i32_0, %c0_i32_1 : i32, i32, i32
  }
  func.func @transform_7(%arg0: i32) -> (i32, i32) {
    %c0_i32 = arith.constant 0 : i32
    %c0_i32_0 = arith.constant 0 : i32
    %c0_i32_1 = arith.constant 0 : i32
    return %c0_i32, %c0_i32_0 : i32, i32
  }
  func.func @transform_8(%arg0: i32) -> (i32, i32) {
    %c0_i32 = arith.constant 0 : i32
    %c0_i32_0 = arith.constant 0 : i32
    %c0_i32_1 = arith.constant 0 : i32
    return %c0_i32, %c0_i32_0 : i32, i32
  }
  func.func @transform_9(%arg0: i32) -> (i32, i32) {
    %c0_i32 = arith.constant 0 : i32
    %c0_i32_0 = arith.constant 0 : i32
    %c0_i32_1 = arith.constant 0 : i32
    return %c0_i32, %c0_i32_0 : i32, i32
  }
  func.func @transform_10(%arg0: i32) -> (i32, i32, i32) {
    %c0_i32 = arith.constant 0 : i32
    %c0_i32_0 = arith.constant 0 : i32
    %c0_i32_1 = arith.constant 0 : i32
    return %arg0, %c0_i32, %c0_i32_0 : i32, i32, i32
  }
}

</mosaic_0001>

<bundles_post_ra>
// kernel: tpu_custom_call.1
= control target key start
LH: loop header
LB: loop body
LE: loop exit
PB: predicated region body
PF: predicated region fallthrough
CT: control target
= control target key end

     0   :  { %s2264_s0 = inlined_call_operand.vmem [shape: bf16[24,101], index: 0, kind: input, shape index: {}]   ;;  %s2265_s1 = inlined_call_operand.vmem [shape: bf16[24,2], index: 1, kind: input, shape index: {}]   ;;  %s2266_s2 = inlined_call_operand.vmem [shape: bf16[101,80], index: 2, kind: input, shape index: {}]   ;;  %s2267_s3 = inlined_call_operand.vmem [shape: bf16[2,80], index: 3, kind: input, shape index: {}]   ;;  %s2268_s4 = inlined_call_operand.vmem [shape: f32[1,80], index: 4, kind: input, shape index: {}]   ;;  %s2269_s5 = inlined_call_operand.hbm [shape: bf16[7,80,80], index: 5, kind: input, shape index: {}]   ;;  %s2270_s6 = inlined_call_operand.vmem [shape: f32[7,1,80], index: 6, kind: input, shape index: {}]   ;;  %s2271_s7 = inlined_call_operand.vmem [shape: bf16[80,80], index: 7, kind: input, shape index: {}]   ;;  %s2272_s8 = inlined_call_operand.vmem [shape: f32[1,80], index: 8, kind: input, shape index: {}]   ;;  %s2273_s9 = inlined_call_operand.<no memory space> [shape: f32[1,1], index: 9, kind: input, shape index: {}]   ;;  %s2274_s10 = inlined_call_operand.hbm [shape: f32[3,1,8], index: 10, kind: output, shape index: {}]  }
   0x1   :  { %v15_v0 = vstv %s2273_s9 }
   0x2   :  { %16 = vst [vmem:[#allocation2] sm:$0x1] %v15_v0 }
   0x3   :  { %17 = vsyncpa [#allocation4], 0 }
   0x4   :  { %18 = vsyncpa [#allocation5], 0 }
   0x5   :  { %20 = vsyncpa [#allocation5 + $0x1], 0  ;;  %s1976_s15 = smov 0   ;;  %s1978_s16 = smov 0  }
   0x6   :  { %s1980_s17 = smov 0   ;;  %s1982_s18 = smov 0  }
   0x7 LB: > { %s1997_s9 = sadd.s32 4294967295, %s1908_s18   ;;  %s1417_s19 = sadd.s32 4294967294, %s1908_s18   ;;  %s1908_s18 = sphi %s1982_s18, %s2290_s18   ;;  %s1904_s17 = sphi %s1980_s17, %s2289_s17   ;;  %s1900_s16 = sphi %s1978_s16, %s2288_s16   ;;  %s1896_s15 = sphi %s1976_s15, %s2287_s15  }
   0x8   : > { %s2001_s20 = sadd.s32 1, %s1908_s18   ;;  %s253_s21 = sadd.s32 1, %s1904_s17 }
   0x9   : > { %s250_s22 = ssub.s32 %s1908_s18, %s2001_s20  ;;  %p263_p0 = scmp.ne.s32.totalorder %s1904_s17, %s1900_s16 }
   0xa   : > { %p251_p1 = scmp.eq.s32.totalorder %s250_s22, 0  ;;  %p264_p2 = scmp.eq.s32.totalorder %s1997_s9, 2 }
   0xb   : > { %p269_p3 = scmp.ne.s32.totalorder %s1900_s16, %s1896_s15  ;;  %p270_p4 = scmp.eq.s32.totalorder %s1417_s19, 2 }
   0xc   : > { %s2012_s23 = scalar_select %p251_p1, %s1904_s17, %s253_s21  }
   0xd   : > { %p2014_p5 = por %p264_p2, %p263_p0  ;;  %p2018_p6 = por %p270_p4, %p269_p3 }
   0xe   : > { %p1418_p7 = scmp.ge.s32.totalorder %s1908_s18, 1  ;;  %p277_p8 = scmp.lt.s32.totalorder %s1908_s18, 4 }
   0xf   : > { %s2278_s24 = scalar_select %p2014_p5, 1, 0 }
  0x10   : > { %s2279_s25 = scalar_select %p2018_p6, 1, 0 }
  0x11   : > { %p2275_p9 = scmp.eq.s32.totalorder %s1997_s9, 0  ;;  %p2025_p10 = pnand %p1418_p7, %p277_p8 }
  0x12   : > { %s1910_s27 = smov [#allocation3]   ;;  %s1814_s12 = scalar_lea.hbm %s2269_s5, 4480 }
  0x13   : > { %s2280_s26 = scalar_select %p2025_p10, 1, 0 }
  0x14   : > { %s298_s28 = sshll.u32 %s1910_s27, 4  ;;  %p1700_p11 = pneg %p2025_p10  ;;  %s299_s28 = int_to_ptr.vmem [resolvable:$true] %s298_s28 }
  0x15   : > { %p1815_p13 = scmp.ne.s32.totalorder %s2269_s5, %s1814_s12  ;;  %p1821_p3 = scmp.lt.u32.totalorder %s1814_s12, %s2269_s5 }
  0x16   : > { %p2033_p12 = pnand %p2275_p9, %p1700_p11 }
  0x18   : > { %p1816_p0 = pneg %p2033_p12 }
  0x1a   : > { %p1817_p1 = pnand %p1816_p0, %p1815_p13 }
  0x1c   : > { %p1818_p2 = pneg %p1817_p1 }
  0x1e   : > { %p1823_p4 = pnand %p1821_p3, %p1818_p2 }
  0x20   : > { %1826 = shalt.err (!%p1823_p4)
}
  0x21   : > { %s1827_s22 = scalar_lea.vmem %s299_s28, 4480  ;;  %p1835_p9 = scmp.lt.s32.totalorder %s299_s28, %s299_s28 }
  0x22   : > { %p1828_p7 = scmp.ne.s32.totalorder %s299_s28, %s1827_s22  ;;  %p1836_p6 = scmp.lt.s32.totalorder %s1827_s22, %s1827_s22 }
  0x24   : > { %p1830_p8 = pnand %p1828_p7, %p1816_p0  ;;  %p1837_p5 = por %p1836_p6, %p1835_p9 }
  0x26   : > { %p1831_p11 = pneg %p1830_p8 }
  0x28   : > { %p1838_p10 = pnand %p1837_p5, %p1831_p11 }
  0x2a   : > { %1841 = shalt.err (!%p1838_p10)
}
  0x2b   : > { %s1911_s27 = smov 64   ;;  %s1912_s30 = smov 4  }
  0x2c   : > { %1703 = dma.hbm_to_vmem [thread:$0]  (!%p2033_p12), %s2269_s5, 4480, %s299_s28, [#allocation4], %s1911_s27, %s1911_s27, %s1912_s30  }
  0x2d   : > { %p2282_p13 = scmp.ne.s32.totalorder %s2280_s26, 0 }
  0x2e   : > { %p2283_p1 = scmp.eq.s32.totalorder (!%p2282_p13), %s1997_s9, 0 }
  0x2f   : > { %340 = sbr.rel (%p2282_p13) target bundleno = 2295 (0x8f7), region = 60 }
  0x36   : > { %1887 = dma.done.wait (%p2283_p1), [#allocation4], 4480   ;;  %p2284_p0 = pmov %p2283_p1 }
  0x37   : > { %p380_p5 = scmp.lt.s32.totalorder %s1997_s9, 2  ;;  %v1913_v1 = vmov 0.0   ;;  %vm1914_vm0 = vmmov 0   ;;  %vm409_vm1 = vcmask 1040384   ;;  %vm496_vm2 = vcmask 1041408   ;;  %v1751_v5 = vld [vmem:[%s2266_s2] sm:$0xff]  }
  0x38   : > { %1889 = vsyncadd (%p2284_p0), [#allocation4], 4294962816  ;;  %1558 = vmatprep.subr.bf16.mxu1 %v1913_v1  ;;  %1560 = vmatprep.mubr.msk.bf16.mxu1 %vm1914_vm0, %v1913_v1  ;;  %v404_v2 = vld [vmem:[%s2267_s3] sm:$0x1]  ;;  %vm405_vm3 = vcmask 15360   ;;  %vm497_vm4 = vcmask 1042432  }
  0x39   : > { %s2064_s28 = scalar_select %p380_p5, %s1997_s9, 2  ;;  %1582 = vmatprep.subr.bf16.mxu0 %v1913_v1  ;;  %1592 = vmatprep.mubr.msk.bf16.mxu0 %vm1914_vm0, %v1913_v1  ;;  %v411_v4 = vsel %vm409_vm1, %v404_v2, 0  ;;  %v1915_v6 = vmov 65535   ;;  %v1752_v8 = vld [vmem:[%s2266_s2 + $0x8] sm:$0xff]   ;;  %v1753_v10 = vld [vmem:[%s2266_s2 + $0x10] sm:$0xff]   ;;  %v1754_v11 = vld [vmem:[%s2266_s2 + $0x18] sm:$0xff]  }
  0x3a   : > { %1559 = vmatpush3.bf16.msra.mxu1 %v411_v4  ;;  %v498_v7 = vsel %vm496_vm2, 4294967295, %v1915_v6  ;;  %v1755_v12 = vld [vmem:[%s2266_s2 + $0x20] sm:$0xff]   ;;  %v1756_v13 = vld [vmem:[%s2266_s2 + $0x28] sm:$0xff]   ;;  %v1757_v14 = vld [vmem:[%s2266_s2 + $0x30] ss:$0 sps:$4 sm:$0x77]  }
  0x3b   : > { %s1423_s26 = sshll.u32 %s2064_s28, 2  ;;  %1564 = vmatprep.subr.bf16.mxu1 %v1913_v1  ;;  %v499_v9 = vsel %vm497_vm4, %v498_v7, 0  ;;  %vm492_vm5 = vcmask 826368   ;;  %v1758_v17 = vld [vmem:[#allocation3] sm:$0xff]   ;;  %v1759_v18 = vld [vmem:[#allocation3 + $0x8] sm:$0xff]   ;;  %v1760_v19 = vld [vmem:[#allocation3 + $0x10] sm:$0xff]  }
  0x3c   : > { %s387_s14 = scalar_lea.vmem %s2265_s1, %s1423_s26  ;;  %s383_s12 = scalar_lea.vmem %s2264_s0, %s1423_s26  ;;  %v501_v15 = vand.u32 %v1757_v14, %v499_v9  ;;  %1583 = vmatpush3.bf16.msra.mxu0 %v1758_v17  ;;  %v1761_v20 = vld [vmem:[#allocation3 + $0x18] sm:$0xff]   ;;  %v1762_v21 = vld [vmem:[#allocation3 + $0x20] sm:$0xff]   ;;  %vm600_vm6 = vcmask 654336   ;;  %v1763_v34 = vld [vmem:[#allocation3 + $0x28] sm:$0xff]   ;;  %vm1323_vm7 = vcmask 57344  }
  0x3d   : > { %v403_v3 = vld [vmem:[%s387_s14] sm:$0xf]  ;;  %1584 = vmatprep.subr.bf16.mxu0 %v1913_v1  ;;  %v1764_v36 = vld [vmem:[#allocation3 + $0x30] sm:$0xff]   ;;  %v1767_v39 = vld [vmem:[#allocation3 + $0x48] sm:$0xff]   ;;  %s378_s21 = sand.u32 1, %s1900_s16   ;;  %s1497_s22 = sshll.u32 %s1997_s9, 4 }
  0x3e   : > { %1561 = vmatmul.mubr.msk.bf16.vlgmr.msra.gmra.mrb[0].mxu1 %vm405_vm3, %v403_v3  ;;  %v389_v16 = vld [vmem:[%s383_s12] sm:$0xf]  ;;  %v1768_v40 = vld [vmem:[#allocation3 + $0x50] sm:$0xff]   ;;  %v1771_v51 = vld [vmem:[#allocation3 + $0x68] sm:$0xff]   ;;  %s379_s27 = scalar_lea.vmem [#allocation6], %s378_s21  ;;  %s2222_s29 = scalar_lea.hbm %s2274_s10, %s1497_s22 }
  0x3f   : > { %1565 = vmatpush3.bf16.msra.mxu1 %v1751_v5  ;;  %1578 = vmatprep.mubr.msk.bf16.mxu1 %vm1914_vm0, %v1913_v1  ;;  %v1434_v27 = vld [vmem:[%s2268_s4] ss:$0 sm:$0xff]  ;;  %v1766_v38 = vld [vmem:[#allocation3 + $0x40] sm:$0xff]   ;;  %v1772_v52 = vld [vmem:[#allocation3 + $0x70] sm:$0xff]   ;;  %s1338_s30 = sshll.u32 %s379_s27, 4  ;;  %s1326_s12 = scalar_lea.sflag [#allocation5], %s378_s21  ;;  %s2224_s30 = int_to_ptr.vmem [resolvable:$true] %s1338_s30 }
  0x40   : > { %1566 = vmatprep.subr.bf16.mxu1 %v1913_v1  ;;  %1585 = vmatpush3.bf16.msra.mxu0 %v1759_v18  ;;  %v1765_v37 = vld [vmem:[#allocation3 + $0x38] sm:$0xff]   ;;  %v1770_v50 = vld [vmem:[#allocation3 + $0x60] sm:$0xff]   ;;  %v1775_v63 = vld [vmem:[#allocation3 + $0x88] sm:$0xff]   ;;  %s1842_s28 = scalar_lea.vmem %s2224_s30, 16  ;;  %p2285_p9 = scmp.ne.s32.totalorder %s2278_s24, 0 }
  0x41   : > { %1586 = vmatprep.subr.bf16.mxu0 %v1913_v1  ;;  %v1435_v41 = vld [vmem:[%s2270_s6] ss:$0 sm:$0xff]  ;;  %v1443_v54 = vld [vmem:[%s2270_s6 + $0x1] ss:$0 sm:$0xff]  ;;  %v1776_v0 = vld [vmem:[#allocation3 + $0x90] sm:$0xff]   ;;  %p1843_p6 = scmp.ne.s32.totalorder %s2224_s30, %s1842_s28  ;;  %s1917_s9 = smov [#allocation6]  }
  0x42   : > { %v1769_v49 = vld [vmem:[#allocation3 + $0x58] sm:$0xff]   ;;  %v1774_v62 = vld [vmem:[#allocation3 + $0x80] sm:$0xff]   ;;  %s1846_s26 = sshll.u32 %s1917_s9, 4  ;;  %s1847_s26 = int_to_ptr.vmem [resolvable:$false] %s1846_s26 }
  0x43   : > { %1567 = vmatpush3.bf16.msra.mxu1 %v1752_v8  ;;  %v1773_v53 = vld [vmem:[#allocation3 + $0x78] sm:$0xff]   ;;  %v1778_v3 = vld [vmem:[#allocation3 + $0xa0] sm:$0xff]   ;;  %p1844_p10 = pnand %p1843_p6, %p2285_p9  ;;  %s1848_s14 = scalar_lea.vmem %s1847_s26, 32 }
  0x44   : > { %1568 = vmatprep.subr.bf16.mxu1 %v1913_v1  ;;  %1587 = vmatpush3.bf16.msra.mxu0 %v1760_v19  ;;  %v1777_v2 = vld [vmem:[#allocation3 + $0x98] sm:$0xff]   ;;  %v1451_v4 = vld [vmem:[%s2270_s6 + $0x2] ss:$0 sm:$0xff]  ;;  %v1459_v17 = vld [vmem:[%s2270_s6 + $0x3] ss:$0 sm:$0xff]  ;;  %p1849_p2 = scmp.lt.s32.totalorder %s2224_s30, %s1847_s26  ;;  %p1850_p3 = scmp.lt.s32.totalorder %s1848_s14, %s1842_s28 }
  0x45   : > { %1588 = vmatprep.subr.bf16.mxu0 %v1913_v1  ;;  %v1781_v14 = vld [vmem:[#allocation3 + $0xb8] sm:$0xff]   ;;  %p1845_p12 = pneg %p1844_p10 }
  0x46   : > { %p1851_p4 = por %p1850_p3, %p1849_p2 }
  0x47   : > { %1569 = vmatpush3.bf16.msra.mxu1 %v1753_v10 }
  0x48   : > { %1570 = vmatprep.subr.bf16.mxu1 %v1913_v1  ;;  %1589 = vmatpush3.bf16.msra.mxu0 %v1761_v20  ;;  %p1852_p7 = pnand %p1851_p4, %p1845_p12 }
  0x49   : > { %1590 = vmatprep.subr.bf16.mxu0 %v1913_v1 }
  0x4b   : > { %1571 = vmatpush3.bf16.msra.mxu1 %v1754_v11 }
  0x4c   : > { %1572 = vmatprep.subr.bf16.mxu1 %v1913_v1  ;;  %1591 = vmatpush3.bf16.msra.mxu0 %v1762_v21 }
  0x4d   : > { %1596 = vmatprep.subr.bf16.mxu0 %v1913_v1 }
  0x4f   : > { %1573 = vmatpush3.bf16.msra.mxu1 %v1755_v12  ;;  %v1779_v12 = vld [vmem:[#allocation3 + $0xa8] sm:$0xff]  }
  0x50   : > { %1574 = vmatprep.subr.bf16.mxu1 %v1913_v1 }
  0x53   : > { %1575 = vmatpush3.bf16.msra.mxu1 %v1756_v13  ;;  %v1780_v13 = vld [vmem:[#allocation3 + $0xb0] sm:$0xff]  }
  0x54   : > { %1576 = vmatprep.subr.bf16.mxu1 %v1913_v1 }
  0x57   : > { %1577 = vmatpush3.bf16.msra.mxu1 %v501_v15  ;;  %v1782_v15 = vld [vmem:[#allocation3 + $0xc0] sm:$0xff]  }
  0x58   : > { %1610 = vmatprep.subr.bf16.mxu1 %v1913_v1 }
  0x5a   : > { %1579 = vmatmul.mubr.msk.bf16.vlgmr.msra.gmra.mrb[4].mxu1 %vm492_vm5, %v389_v16  ;;  %v1783_v16 = vld [vmem:[#allocation3 + $0xc8] sm:$0xff]  }
  0x5b   : > { %1620 = vmatprep.mubr.msk.bf16.mxu1 %vm1914_vm0, %v1913_v1  ;;  %1611 = vmatpush3.bf16.msra.mxu1 %v1768_v40  ;;  %v1791_v40 = vld [vmem:[#allocation3 + $0x108] sm:$0xff]  }
  0x5c   : > { %1612 = vmatprep.subr.bf16.mxu1 %v1913_v1 }
  0x5f   : > { %1613 = vmatpush3.bf16.msra.mxu1 %v1769_v49 }
  0x60   : > { %1614 = vmatprep.subr.bf16.mxu1 %v1913_v1 }
  0x63   : > { %1615 = vmatpush3.bf16.msra.mxu1 %v1770_v50 }
  0x64   : > { %1616 = vmatprep.subr.bf16.mxu1 %v1913_v1 }
  0x67   : > { %1617 = vmatpush3.bf16.msra.mxu1 %v1771_v51  ;;  %v1794_v51 = vld [vmem:[%s2271_s7 + $0x8] sm:$0xff]  }
  0x68   : > { %1618 = vmatprep.subr.bf16.mxu1 %v1913_v1 }
  0x6b   : > { %1619 = vmatpush3.bf16.msra.mxu1 %v1772_v52  ;;  %v1795_v52 = vld [vmem:[%s2271_s7 + $0x10] sm:$0xff]  }
  0x6c   : > { %1638 = vmatprep.subr.bf16.mxu1 %v1913_v1 }
 0x111   : > { %v447_v22 = vpop.f32.mrb[0].mxu1 }
 0x112   : > { %v1562_v23 = vpop.f32.mrb[1].mxu1 }
 0x113   : > { %v450_v24 = vpop.f32.mrb[2].mxu1 }
 0x114   : > { %v1563_v25 = vpop.f32.mrb[3].mxu1 }
 0x115   : > { %v1784_v25 = vld [vmem:[#allocation3 + $0xd0] sm:$0xff]  }
 0x12d   : > { %v537_v26 = vpop.f32.mrb[4].mxu1 }
 0x12e   : > { %v538_v28 = vadd.f32 %v537_v26, %v447_v22  ;;  %v1580_v29 = vpop.f32.mrb[5].mxu1  ;;  %v1785_v26 = vld [vmem:[#allocation3 + $0xd8] sm:$0xff]  }
 0x12f   : > { %v540_v30 = vpop.f32.mrb[6].mxu1  ;;  %v1788_v29 = vld [vmem:[#allocation3 + $0xf0] sm:$0xff]  }
 0x130   : > { %v550_v31 = vadd.f32 %v1434_v27, %v538_v28  ;;  %v1581_v32 = vpop.f32.mrb[7].mxu1  ;;  %v1786_v27 = vld [vmem:[#allocation3 + $0xe0] sm:$0xff]   ;;  %v1787_v28 = vld [vmem:[#allocation3 + $0xe8] sm:$0xff]  }
 0x131   : > { %v1467_v30 = vld [vmem:[%s2270_s6 + $0x4] ss:$0 sm:$0xff] }
 0x132   : > { %1798 = vtanh.f32 %v550_v31 }
 0x13c   : > { %v1799_v33 = vpop.eup %1798 }
 0x13d   : > { %v552_v35 = vpack.c.bf16 %v1799_v33, %v1799_v33 }
 0x13f   : > { %1593 = vmatmul.mubr.msk.bf16.vlgmr.msra.gmra.mrb[0].mxu0 %vm600_vm6, %v552_v35 }
 0x140   : > { %1597 = vmatpush3.bf16.msra.mxu0 %v1763_v34  ;;  %1606 = vmatprep.mubr.msk.bf16.mxu0 %vm1914_vm0, %v1913_v1 }
 0x141   : > { %1598 = vmatprep.subr.bf16.mxu0 %v1913_v1 }
 0x144   : > { %1599 = vmatpush3.bf16.msra.mxu0 %v1764_v36 }
 0x145   : > { %1600 = vmatprep.subr.bf16.mxu0 %v1913_v1 }
 0x148   : > { %1601 = vmatpush3.bf16.msra.mxu0 %v1765_v37 }
 0x149   : > { %1602 = vmatprep.subr.bf16.mxu0 %v1913_v1 }
 0x14c   : > { %1603 = vmatpush3.bf16.msra.mxu0 %v1766_v38  ;;  %v1789_v38 = vld [vmem:[#allocation3 + $0xf8] sm:$0xff]  }
 0x14d   : > { %1604 = vmatprep.subr.bf16.mxu0 %v1913_v1 }
 0x150   : > { %1605 = vmatpush3.bf16.msra.mxu0 %v1767_v39  ;;  %v1790_v39 = vld [vmem:[#allocation3 + $0x100] sm:$0xff]  }
 0x151   : > { %1624 = vmatprep.subr.bf16.mxu0 %v1913_v1 }
 0x212   : > { %v638_v42 = vpop.f32.mrb[0].mxu0 }
 0x213   : > { %v639_v43 = vadd.f32 %v1435_v41, %v638_v42  ;;  %v1594_v44 = vpop.f32.mrb[1].mxu0  ;;  %v1792_v41 = vld [vmem:[#allocation3 + $0x110] sm:$0xff]   ;;  %v1793_v42 = vld [vmem:[%s2271_s7] sm:$0xff]  }
 0x214   : > { %v641_v45 = vpop.f32.mrb[2].mxu0 }
 0x215   : > { %1800 = vtanh.f32 %v639_v43  ;;  %v1595_v46 = vpop.f32.mrb[3].mxu0  ;;  %v1475_v43 = vld [vmem:[%s2270_s6 + $0x5] ss:$0 sm:$0xff] }
 0x21f   : > { %v1801_v47 = vpop.eup %1800 }
 0x220   : > { %v645_v48 = vpack.c.bf16 %v1801_v47, %v1801_v47 }
 0x222   : > { %1607 = vmatmul.mubr.msk.bf16.vlgmr.msra.gmra.mrb[4].mxu0 %vm600_vm6, %v645_v48 }
 0x223   : > { %1634 = vmatprep.mubr.msk.bf16.mxu0 %vm1914_vm0, %v1913_v1  ;;  %1625 = vmatpush3.bf16.msra.mxu0 %v1773_v53  ;;  %v1796_v53 = vld [vmem:[%s2271_s7 + $0x18] sm:$0xff]  }
 0x224   : > { %1626 = vmatprep.subr.bf16.mxu0 %v1913_v1 }
 0x227   : > { %1627 = vmatpush3.bf16.msra.mxu0 %v1774_v62 }
 0x228   : > { %1628 = vmatprep.subr.bf16.mxu0 %v1913_v1 }
 0x22b   : > { %1629 = vmatpush3.bf16.msra.mxu0 %v1775_v63  ;;  %v1916_v63 = vmov 0  }
 0x22c   : > { %1630 = vmatprep.subr.bf16.mxu0 %v1913_v1  ;;  %1750 = vset.pattern.permute.xlu0 %v1916_v63 }
 0x22f   : > { %1631 = vmatpush3.bf16.msra.mxu0 %v1776_v0 }
 0x230   : > { %1632 = vmatprep.subr.bf16.mxu0 %v1913_v1 }
 0x233   : > { %1633 = vmatpush3.bf16.msra.mxu0 %v1777_v2 }
 0x234   : > { %1652 = vmatprep.subr.bf16.mxu0 %v1913_v1 }
 0x2f5   : > { %v732_v55 = vpop.f32.mrb[4].mxu0 }
 0x2f6   : > { %v733_v56 = vadd.f32 %v1443_v54, %v732_v55  ;;  %v1608_v57 = vpop.f32.mrb[5].mxu0  ;;  %v1797_v54 = vld [vmem:[%s2271_s7 + $0x20] sm:$0xff]  }
 0x2f7   : > { %v735_v58 = vpop.f32.mrb[6].mxu0  ;;  %v1483_v55 = vld [vmem:[%s2270_s6 + $0x6] ss:$0 sm:$0xff] }
 0x2f8   : > { %1802 = vtanh.f32 %v733_v56  ;;  %v1609_v59 = vpop.f32.mrb[7].mxu0 }
 0x302   : > { %v1803_v60 = vpop.eup %1802 }
 0x303   : > { %v739_v61 = vpack.c.bf16 %v1803_v60, %v1803_v60 }
 0x305   : > { %1621 = vmatmul.mubr.msk.bf16.vlgmr.msra.gmra.mrb[8].mxu1 %vm600_vm6, %v739_v61 }
 0x306   : > { %1648 = vmatprep.mubr.msk.bf16.mxu1 %vm1914_vm0, %v1913_v1  ;;  %1639 = vmatpush3.bf16.msra.mxu1 %v1778_v3 }
 0x307   : > { %1640 = vmatprep.subr.bf16.mxu1 %v1913_v1 }
 0x30a   : > { %1641 = vmatpush3.bf16.msra.mxu1 %v1779_v12 }
 0x30b   : > { %1642 = vmatprep.subr.bf16.mxu1 %v1913_v1 }
 0x30e   : > { %1643 = vmatpush3.bf16.msra.mxu1 %v1780_v13 }
 0x30f   : > { %1644 = vmatprep.subr.bf16.mxu1 %v1913_v1 }
 0x312   : > { %1645 = vmatpush3.bf16.msra.mxu1 %v1781_v14 }
 0x313   : > { %1646 = vmatprep.subr.bf16.mxu1 %v1913_v1 }
 0x316   : > { %1647 = vmatpush3.bf16.msra.mxu1 %v1782_v15 }
 0x317   : > { %1666 = vmatprep.subr.bf16.mxu1 %v1913_v1 }
 0x3d8   : > { %v826_v5 = vpop.f32.mrb[8].mxu1 }
 0x3d9   : > { %v827_v6 = vadd.f32 %v1451_v4, %v826_v5  ;;  %v1622_v7 = vpop.f32.mrb[9].mxu1 }
 0x3da   : > { %v829_v8 = vpop.f32.mrb[10].mxu1 }
 0x3db   : > { %1804 = vtanh.f32 %v827_v6  ;;  %v1623_v9 = vpop.f32.mrb[11].mxu1  ;;  %v1304_v8 = vld [vmem:[#allocation2] sm:$0x1] }
 0x3dc   : > { %v1310_v9 = vlaneseq }
 0x3de   : > { %v1317_v13 = vand.u32 127, %v1310_v9 }
 0x3e5   : > { %v1805_v10 = vpop.eup %1804 }
 0x3e6   : > { %v833_v11 = vpack.c.bf16 %v1805_v10, %v1805_v10  ;;  %v1311_v10 = vshrl.u32 %v1310_v9, 7 }
 0x3e8   : > { %1635 = vmatmul.mubr.msk.bf16.vlgmr.msra.gmra.mrb[8].mxu0 %vm600_vm6, %v833_v11  ;;  %v1312_v12 = vsub.s32 0, %v1311_v10  ;;  %v1320_v15 = vsub.s32 %v1317_v13, %v1311_v10 }
 0x3e9   : > { %1662 = vmatprep.mubr.msk.bf16.mxu0 %vm1914_vm0, %v1913_v1  ;;  %1653 = vmatpush3.bf16.msra.mxu0 %v1783_v16 }
 0x3ea   : > { %1654 = vmatprep.subr.bf16.mxu0 %v1913_v1 }
 0x3ed   : > { %1655 = vmatpush3.bf16.msra.mxu0 %v1784_v25 }
 0x3ee   : > { %1656 = vmatprep.subr.bf16.mxu0 %v1913_v1 }
 0x3f1   : > { %1657 = vmatpush3.bf16.msra.mxu0 %v1785_v26 }
 0x3f2   : > { %1658 = vmatprep.subr.bf16.mxu0 %v1913_v1 }
 0x3f5   : > { %1659 = vmatpush3.bf16.msra.mxu0 %v1786_v27 }
 0x3f6   : > { %1660 = vmatprep.subr.bf16.mxu0 %v1913_v1 }
 0x3f9   : > { %1661 = vmatpush3.bf16.msra.mxu0 %v1787_v28 }
 0x3fa   : > { %1680 = vmatprep.subr.bf16.mxu0 %v1913_v1 }
 0x4bb   : > { %v920_v18 = vpop.f32.mrb[8].mxu0 }
 0x4bc   : > { %v921_v19 = vadd.f32 %v1459_v17, %v920_v18  ;;  %v1636_v20 = vpop.f32.mrb[9].mxu0 }
 0x4bd   : > { %v923_v21 = vpop.f32.mrb[10].mxu0 }
 0x4be   : > { %1806 = vtanh.f32 %v921_v19  ;;  %v1637_v22 = vpop.f32.mrb[11].mxu0 }
 0x4c8   : > { %v1807_v23 = vpop.eup %1806 }
 0x4c9   : > { %v927_v24 = vpack.c.bf16 %v1807_v23, %v1807_v23 }
 0x4cb   : > { %1649 = vmatmul.mubr.msk.bf16.vlgmr.msra.gmra.mrb[12].mxu1 %vm600_vm6, %v927_v24 }
 0x4cc   : > { %1676 = vmatprep.mubr.msk.bf16.mxu1 %vm1914_vm0, %v1913_v1  ;;  %1667 = vmatpush3.bf16.msra.mxu1 %v1788_v29 }
 0x4cd   : > { %1668 = vmatprep.subr.bf16.mxu1 %v1913_v1 }
 0x4d0   : > { %1669 = vmatpush3.bf16.msra.mxu1 %v1789_v38 }
 0x4d1   : > { %1670 = vmatprep.subr.bf16.mxu1 %v1913_v1 }
 0x4d4   : > { %1671 = vmatpush3.bf16.msra.mxu1 %v1790_v39 }
 0x4d5   : > { %1672 = vmatprep.subr.bf16.mxu1 %v1913_v1 }
 0x4d8   : > { %1673 = vmatpush3.bf16.msra.mxu1 %v1791_v40 }
 0x4d9   : > { %1674 = vmatprep.subr.bf16.mxu1 %v1913_v1 }
 0x4dc   : > { %1675 = vmatpush3.bf16.msra.mxu1 %v1792_v41 }
 0x59e   : > { %v1014_v31 = vpop.f32.mrb[12].mxu1 }
 0x59f   : > { %v1015_v32 = vadd.f32 %v1467_v30, %v1014_v31  ;;  %v1650_v33 = vpop.f32.mrb[13].mxu1 }
 0x5a0   : > { %v1017_v34 = vpop.f32.mrb[14].mxu1 }
 0x5a1   : > { %1808 = vtanh.f32 %v1015_v32  ;;  %v1651_v35 = vpop.f32.mrb[15].mxu1 }
 0x5ab   : > { %v1809_v36 = vpop.eup %1808 }
 0x5ac   : > { %v1021_v37 = vpack.c.bf16 %v1809_v36, %v1809_v36 }
 0x5ae   : > { %1663 = vmatmul.mubr.msk.bf16.vlgmr.msra.gmra.mrb[12].mxu0 %vm600_vm6, %v1021_v37 }
 0x5af   : > { %1690 = vmatprep.mubr.msk.bf16.mxu0 %vm1914_vm0, %v1913_v1  ;;  %1681 = vmatpush3.bf16.msra.mxu0 %v1793_v42 }
 0x5b0   : > { %1682 = vmatprep.subr.bf16.mxu0 %v1913_v1 }
 0x5b3   : > { %1683 = vmatpush3.bf16.msra.mxu0 %v1794_v51 }
 0x5b4   : > { %1684 = vmatprep.subr.bf16.mxu0 %v1913_v1 }
 0x5b7   : > { %1685 = vmatpush3.bf16.msra.mxu0 %v1795_v52 }
 0x5b8   : > { %1686 = vmatprep.subr.bf16.mxu0 %v1913_v1 }
 0x5bb   : > { %1687 = vmatpush3.bf16.msra.mxu0 %v1796_v53 }
 0x5bc   : > { %1688 = vmatprep.subr.bf16.mxu0 %v1913_v1  ;;  %v1490_v1 = vld [vmem:[%s2272_s8] ss:$0 sm:$0xff] }
 0x5bf   : > { %1689 = vmatpush3.bf16.msra.mxu0 %v1797_v54 }
 0x681   : > { %v1108_v44 = vpop.f32.mrb[12].mxu0 }
 0x682   : > { %v1109_v45 = vadd.f32 %v1475_v43, %v1108_v44  ;;  %v1664_v46 = vpop.f32.mrb[13].mxu0 }
 0x683   : > { %v1111_v47 = vpop.f32.mrb[14].mxu0 }
 0x684   : > { %1810 = vtanh.f32 %v1109_v45  ;;  %v1665_v48 = vpop.f32.mrb[15].mxu0 }
 0x68e   : > { %v1811_v49 = vpop.eup %1810 }
 0x68f   : > { %v1115_v50 = vpack.c.bf16 %v1811_v49, %v1811_v49 }
 0x691   : > { %1677 = vmatmul.mubr.msk.bf16.vlgmr.msra.gmra.mrb[16].mxu1 %vm600_vm6, %v1115_v50 }
 0x764   : > { %v1202_v56 = vpop.f32.mrb[16].mxu1 }
 0x765   : > { %v1203_v57 = vadd.f32 %v1483_v55, %v1202_v56  ;;  %v1678_v58 = vpop.f32.mrb[17].mxu1 }
 0x766   : > { %v1205_v59 = vpop.f32.mrb[18].mxu1 }
 0x767   : > { %1812 = vtanh.f32 %v1203_v57  ;;  %v1679_v60 = vpop.f32.mrb[19].mxu1 }
 0x771   : > { %v1813_v61 = vpop.eup %1812 }
 0x772   : > { %v1209_v62 = vpack.c.bf16 %v1813_v61, %v1813_v61 }
 0x774   : > { %1691 = vmatmul.mubr.msk.bf16.vlgmr.msra.gmra.mrb[16].mxu0 %vm600_vm6, %v1209_v62 }
 0x847   : > { %v1294_v0 = vpop.f32.mrb[16].mxu0 }
 0x848   : > { %v1295_v2 = vadd.f32 %v1490_v1, %v1294_v0  ;;  %v1692_v3 = vpop.f32.mrb[17].mxu0 }
 0x849   : > { %v1297_v4 = vpop.f32.mrb[18].mxu0 }
 0x84a   : > { %v1693_v5 = vpop.f32.mrb[19].mxu0  ;;  %v1300_v6 = vmul.f32 %v1813_v61, %v1295_v2 }
 0x84c   : > { %v1301_v7 = vsel %vm600_vm6, %v1300_v6, 0.0 }
 0x84d   : > { %1302 = vadd.xlane.f32.xlu0 %v1301_v7 }
 0x863   : > { %1307 = vperm.xlu0 %1750, %v1304_v8  }
 0x8da   : > { %v1303_v11 = vpop.xlane.xlu0 %1302 }
 0x8e2   : > { %v1308_v14 = vpop.permute.xlu0 %1307 }
 0x8e3   : > { %v1313_v16 = vrot.slane %v1308_v14, %v1312_v12 }
 0x8e5   : > { %v1314_v17 = vadd.f32 %v1313_v16, %v1303_v11 }
 0x8e7   : > { %v1321_v18 = vrot.slane %v1314_v17, %v1320_v15 }
 0x8e9   : > { %1324 = vst.msk [vmem:[%s379_s27] sm:$0x1] %vm1323_vm7, %v1321_v18 }
 0x8ea   : > { %1855 = shalt.err (!%p1852_p7)
}
 0x8eb   : > { %s1856_s19 = scalar_lea.hbm %s2222_s29, 16  ;;  %s1860_s27 = scalar_lea.hbm %s2274_s10, 48 }
 0x8ec   : > { %p1857_p8 = scmp.ne.s32.totalorder %s2222_s29, %s1856_s19  ;;  %p1861_p1 = scmp.lt.u32.totalorder %s2222_s29, %s2274_s10 }
 0x8ed   : > { %p1862_p0 = scmp.lt.u32.totalorder %s1860_s27, %s1856_s19  ;;  %p1864_p6 = scmp.lt.u32.totalorder %s1856_s19, %s2222_s29 }
 0x8ee   : > { %p1858_p11 = pnand %p1857_p8, %p2285_p9 }
 0x8ef   : > { %p1863_p5 = por %p1862_p0, %p1861_p1 }
 0x8f0   : > { %p1859_p13 = pneg %p1858_p11 }
 0x8f1   : > { %p1865_p10 = por %p1864_p6, %p1863_p5 }
 0x8f3   : > { %p1866_p12 = pnand %p1865_p10, %p1859_p13 }
 0x8f5   : > { %1869 = shalt.err (!%p1866_p12)
}
 0x8f6   : > { %1698 = dma.vmem_to_hbm [thread:$0]  (%p2285_p9), %s2224_s30, 16, %s2222_s29, %s1326_s12  }
 0x8f7 PF: > { %p1710_p2 = scmp.ge.s32.totalorder %s1908_s18, 2  ;;  %s1350_s28 = sand.u32 1, %s1896_s15  }
 0x8f8   : > { %p2286_p3 = scmp.ne.s32.totalorder %s2279_s25, 0  ;;  %s1351_s9 = scalar_lea.sflag [#allocation5], %s1350_s28 }
 0x8fa   : > { %p1705_p4 = pnand %p1710_p2, %p2286_p3 }
 0x8fc   : > { %1891 = dma.done.wait (!%p1705_p4), %s1351_s9, 16  }
 0x8fd   : > { %1893 = vsyncadd (!%p1705_p4), %s1351_s9, 4294967280  ;;  %p23_p7 = scmp.ge.s32.totalorder %s2001_s20, 5   ;;  %s2287_s15 = smov %s1900_s16 }
 0x8fe   : > { %s2288_s16 = smov %s1904_s17  ;;  %s2289_s17 = smov %s2012_s23 }
 0x8ff   : > { %s2290_s18 = smov %s2001_s20  ;;  %25 = sbr.rel (!%p23_p7) target bundleno = 7 (0x7), region = 115 }
 0x906   :  { %1355 = vsyncpa [#allocation4], 1 }
 0x907   :  { %1357 = vsyncpa [#allocation4 + $0x1], 1 }
 0x908   :  { %1358 = vsyncpa [#allocation5], 1 }
 0x909   :  { %1360 = vsyncpa [#allocation5 + $0x1], 1 }

</bundles_post_ra>
